<compile_context>
chip_gen: v6e
topology: v6e:2x2x1
jax: 0.10.0
libtpu: 0.0.40
codegen_flags: <defaults>
</compile_context>

<pallas_src>
import functools

import jax
import jax.numpy as jnp
import numpy as np
from jax import lax
from jax.experimental import pallas as pl
from jax.experimental.pallas import tpu as pltpu


def _rsum(a):
    """(B, H, W) f32 -> (1, 1) f32, staying vector-shaped throughout."""
    s = jnp.sum(a, axis=2, keepdims=True)    # (B, H, 1)
    s = jnp.sum(s, axis=1, keepdims=True)    # (B, 1, 1)
    return jnp.sum(s, axis=0)                # (1, 1)


def _mae_paint_kernel(pred_ref, tgt_ref, v2_ref, out_ref, *, disp, need_row_mask):
    o = pred_ref[...].astype(jnp.float32)
    t = tgt_ref[...].astype(jnp.float32)
    v2 = v2_ref[...].astype(jnp.float32)          # hole mask of the sparse input (int8 -> f32)

    valid = t != 0.0
    v1 = valid.astype(jnp.float32)                # val_pixels_1 (valid target pixels)
    g = jnp.where(valid, t - o, 0.0)              # target - outputs * val_pixels_1

    _, h, wf = g.shape

    if need_row_mask:
        # Only the sublane-roll row wrap needs masking, and only when the 8-row
        # rounding did not leave >= disp-1 zero guard rows.  This is O(disp)
        # work per block; the per-term column masks are gone (guard bands).
        row = lax.broadcasted_iota(jnp.int32, (1, h, wf), 1)
        row_ok = {i: (row >= i).astype(jnp.float32) for i in range(1, disp)}

    # Shifted-difference terms on full-shape tensors via XLU rolls.  Rolled-in
    # wrap / seam pixels land on v1 == 0 thanks to the zero guard bands, so no
    # masks are needed.  Destination validity (v1) is common to all terms and
    # applied once at the end.
    rel = jnp.zeros_like(g)
    for i in range(disp):
        if i == 0:
            g_i, v_i = g, v1
        else:
            g_i = pltpu.roll(g, i, 1)             # g[h-i, w]
            v_i = pltpu.roll(v1, i, 1)
            if need_row_mask:
                v_i = v_i * row_ok[i]
        for j in range(disp):
            if i == 0 and j == 0:
                continue
            if j == 0:
                rel = rel + jnp.abs(g - g_i) * v_i
            else:
                g_ij = pltpu.roll(g_i, j, 2)      # g[h-i, w-j]
                v_ij = pltpu.roll(v_i, j, 2)
                rel = rel + jnp.abs(g - g_ij) * v_ij
                if i != 0:
                    g_nj = pltpu.roll(g_i, wf - j, 2)   # g[h-i, w+j]  (shift by -j)
                    v_nj = pltpu.roll(v_i, wf - j, 2)
                    rel = rel + jnp.abs(g - g_nj) * v_nj
    rel = rel * v1

    # Per-block partial sums, merged into one lane-dense (1, 4, 128) tile.
    p_abs = _rsum(jnp.abs(g) * v2)                # sum |g| * val_pixels_2
    p_v1v2 = _rsum(v1 * v2)
    p_v1 = _rsum(v1)
    p_rel = _rsum(rel)

    srow = lax.broadcasted_iota(jnp.int32, (4, 128), 0)
    lanes = jnp.zeros((4, 128), jnp.float32)
    for k, p in enumerate((p_abs, p_v1v2, p_v1, p_rel)):
        lanes = lanes + jnp.where(srow == k, p, 0.0)
    out_ref[...] = lanes.reshape(1, 4, 128)


def _largest_divisor_le(n, cap):
    cap = max(1, min(n, cap))
    for d in range(cap, 0, -1):
        if n % d == 0:
            return d
    return 1


def _pick_fold(nc, w, disp):
    """How many images to place side-by-side along W (lane packing)."""
    best, best_score = 1, -1.0
    for f in range(1, nc + 1):
        if nc % f:
            continue
        width = f * (w + disp - 1)
        if width > 1024:
            break
        wfp = -(-width // 128) * 128
        score = (f * w) / wfp                       # lane utilisation
        if nc // f >= 2:                            # mild preference for >= 2 blocks (megacore)
            score += 1e-3
        if score > best_score + 1e-9:
            best, best_score = f, score
    return best


def _vmem_budgets():
    """Generation-aware (block budget, vmem_limit_bytes)."""
    cap = None
    try:
        cap = int(getattr(pltpu.get_tpu_info(), "vmem_capacity_bytes", 0)) or None
    except Exception:
        cap = None
    if cap is None:
        cap = 64 * 2 ** 20                          # conservative: v7x per-TC VMEM
    block_budget = min(int(cap * 0.70), 96 * 2 ** 20)
    vmem_limit = min(int(cap * 0.85), 112 * 2 ** 20)
    return block_budget, vmem_limit


def mae_paint_loss_v1(outputs, target, inputs, disp, *, block_bc=None, fold=None):
    """Pallas implementation of MAEPaintLoss_v1.forward. Returns shape (1,) f32."""
    assert disp > 1
    assert outputs.shape == target.shape == inputs.shape
    N, C, H, W = outputs.shape
    nc = N * C
    gap = disp - 1

    if fold is None:
        fold = _pick_fold(nc, W, disp)
    assert nc % fold == 0, "fold must divide N*C"
    b_total = nc // fold

    # Per-image padded width P: >= disp-1 zero guard columns after every image.
    # Absorb the 128-lane rounding into the guard when possible (single pad).
    P = W + gap
    wf_pad = -(-(fold * P) // 128) * 128
    if wf_pad % fold == 0 and wf_pad // fold >= P:
        P = wf_pad // fold

    # Rows: only take the zero guard rows if the 8-row rounding gives them for
    # free; otherwise the kernel keeps the cheap O(disp) row mask.
    h_pad = -(-H // 8) * 8
    need_row_mask = (h_pad - H) < gap

    def prep(a):
        a = a.reshape(b_total, fold, H, W)
        a = jnp.pad(a, ((0, 0), (0, 0), (0, h_pad - H), (0, P - W)))
        a = a.transpose(0, 2, 1, 3).reshape(b_total, h_pad, fold * P)
        if fold * P != wf_pad:
            a = jnp.pad(a, ((0, 0), (0, 0), (0, wf_pad - fold * P)))
        return a

    # Native dtype for outputs/target (kernel upcasts); hole mask as int8.
    o3 = prep(outputs)
    t3 = prep(target)
    v2i = prep((inputs == 0).astype(jnp.int8))

    block_budget, vmem_limit = _vmem_budgets()
    if block_bc is None:
        in_bytes = outputs.dtype.itemsize
        per_bc = h_pad * wf_pad * (2 * 2 * in_bytes        # pred + tgt, double-buffered
                                   + 2 * 1                 # v2 int8, double-buffered
                                   + (10 + 2 * disp) * 4)  # live f32 temporaries (scales with disp)
        block_bc = _largest_divisor_le(b_total, max(1, block_budget // per_bc))
        # Keep >= 2 grid blocks whenever possible so v7x shards the "parallel"
        # axis across both TensorCores instead of idling one.
        if b_total >= 2 and b_total // block_bc < 2:
            block_bc = _largest_divisor_le(b_total, b_total // 2)
    assert b_total % block_bc == 0, "block_bc must divide the folded batch"
    num_blocks = b_total // block_bc

    in_spec = pl.BlockSpec((block_bc, h_pad, wf_pad), lambda b: (b, 0, 0))
    out_spec = pl.BlockSpec((1, 4, 128), lambda b: (b, 0, 0))

    parts = pl.pallas_call(
        functools.partial(_mae_paint_kernel, disp=disp, need_row_mask=need_row_mask),
        grid=(num_blocks,),
        in_specs=[in_spec, in_spec, in_spec],
        out_specs=out_spec,
        out_shape=jax.ShapeDtypeStruct((num_blocks, 4, 128), jnp.float32),
        compiler_params=pltpu.CompilerParams(
            dimension_semantics=("parallel",),
            vmem_limit_bytes=vmem_limit),
    )(o3, t3, v2i)

    sums = jnp.sum(parts[:, :, 0], axis=0)      # [abs, v1*v2, v1, rel]
    w_abs, w_rel = 0.1, 0.9
    loss = (w_abs * sums[0] / (sums[1] + 1.0)
            + w_rel * (sums[3] / float((disp - 1) ** 2)) / sums[2])
    return loss.reshape(1)


def mae_paint_loss_ref(outputs, target, inputs, disp):
    """Pure-JAX reference mirroring the PyTorch forward exactly."""
    assert disp > 1
    v1 = (target != 0).astype(jnp.float32)
    v2 = (inputs == 0).astype(jnp.float32)
    o = outputs * v1
    loss_abs = jnp.sum(jnp.abs((target - o) * v2))
    loss_rel = jnp.zeros((1,), jnp.float32)
    for i in range(disp):
        for j in range(disp):
            if i == 0 and j != 0:
                loss_rel = loss_rel + jnp.sum(jnp.abs(
                    (target[:, :, :, j:] - target[:, :, :, :-j]
                     - (o[:, :, :, j:] - o[:, :, :, :-j]))
                    * v1[:, :, :, j:] * v1[:, :, :, :-j]))
            elif j == 0 and i != 0:
                loss_rel = loss_rel + jnp.sum(jnp.abs(
                    (target[:, :, i:, :] - target[:, :, :-i, :]
                     - (o[:, :, i:, :] - o[:, :, :-i, :]))
                    * v1[:, :, i:, :] * v1[:, :, :-i, :]))
            elif i != 0 and j != 0:
                loss_rel = loss_rel + jnp.sum(jnp.abs(
                    (target[:, :, i:, j:] - target[:, :, :-i, :-j]
                     - (o[:, :, i:, j:] - o[:, :, :-i, :-j]))
                    * v1[:, :, i:, j:] * v1[:, :, :-i, :-j]))
                loss_rel = loss_rel + jnp.sum(jnp.abs(
                    (target[:, :, i:, :-j] - target[:, :, :-i, j:]
                     - (o[:, :, i:, :-j] - o[:, :, :-i, j:]))
                    * v1[:, :, i:, :-j] * v1[:, :, :-i, j:]))
    w_abs, w_rel = 0.1, 0.9
    loss = (w_abs * loss_abs / (jnp.sum(v1 * v2) + 1)
            + w_rel * (loss_rel / (disp - 1) ** 2) / jnp.sum(v1))
    return loss.reshape(1)


if __name__ == "__main__":
    root = jax.random.PRNGKey(0)

    def make_inputs(shape, key):
        k1, k2, k3, k4, k5 = jax.random.split(key, 5)
        target = (jax.random.normal(k1, shape, jnp.float32)
                  * (jax.random.uniform(k2, shape) > 0.3).astype(jnp.float32))
        inputs = (jax.random.normal(k3, shape, jnp.float32)
                  * (jax.random.uniform(k4, shape) > 0.5).astype(jnp.float32))
        outputs = jax.random.normal(k5, shape, jnp.float32)
        return outputs, target, inputs

    cases = [
        ((2, 4, 16, 16), 3, {}),                        # auto fold=4, 2 parallel blocks, row mask
        ((2, 4, 16, 16), 3, dict(fold=2, block_bc=2)),  # explicit fold / multi-block path
        ((1, 1, 24, 40), 4, {}),                        # no fold, larger disp, W rounded to 128
        ((1, 2, 10, 20), 2, {}),                        # free zero guard rows -> no row mask
    ]
    keys = jax.random.split(root, len(cases))
    for (shape, disp, kw), k in zip(cases, keys):
        o, t, x = make_inputs(shape, k)
        got = jax.block_until_ready(mae_paint_loss_v1(o, t, x, disp, **kw))
        ref = jax.block_until_ready(mae_paint_loss_ref(o, t, x, disp))
        np.testing.assert_allclose(np.asarray(got), np.asarray(ref),
                                   rtol=1e-4, atol=1e-5)
    print("KERNEL_OK")
</pallas_src>

<mosaic_0001>
module attributes {stable_mosaic.version = 11 : i64} {
  func.func @_mae_paint_kernel(%arg0: i32, %arg1: memref<1x16x128xf32, #tpu.memory_space<vmem>>, %arg2: memref<1x16x128xf32, #tpu.memory_space<vmem>>, %arg3: memref<1x16x128xi8, #tpu.memory_space<vmem>>, %arg4: memref<1x4x128xf32, #tpu.memory_space<vmem>>) attributes {dimension_semantics = [#tpu.dimension_semantics<parallel>], iteration_bounds = array<i64: 2>, scalar_prefetch = 0 : i64, scratch_operands = 0 : i64, tpu.core_type = #tpu.core_type<tc>, window_params = [{transform_indices = @transform_0, window_bounds = array<i64: 1, 16, 128>}, {transform_indices = @transform_1, window_bounds = array<i64: 1, 16, 128>}, {transform_indices = @transform_2, window_bounds = array<i64: 1, 16, 128>}, {transform_indices = @transform_3, window_bounds = array<i64: 1, 4, 128>}]} {
    %c0 = arith.constant 0 : index
    %c0_0 = arith.constant 0 : index
    %c0_1 = arith.constant 0 : index
    %0 = vector.load %arg1[%c0, %c0_0, %c0_1] : memref<1x16x128xf32, #tpu.memory_space<vmem>>, vector<1x16x128xf32>
    %c0_2 = arith.constant 0 : index
    %c0_3 = arith.constant 0 : index
    %c0_4 = arith.constant 0 : index
    %1 = vector.load %arg2[%c0_2, %c0_3, %c0_4] : memref<1x16x128xf32, #tpu.memory_space<vmem>>, vector<1x16x128xf32>
    %c0_5 = arith.constant 0 : index
    %c0_6 = arith.constant 0 : index
    %c0_7 = arith.constant 0 : index
    %2 = vector.load %arg3[%c0_5, %c0_6, %c0_7] : memref<1x16x128xi8, #tpu.memory_space<vmem>>, vector<1x16x128xi8>
    %3 = arith.sitofp %2 : vector<1x16x128xi8> to vector<1x16x128xf32>
    %cst = arith.constant 0.000000e+00 : f32
    %4 = vector.broadcast %cst : f32 to vector<1x16x128xf32>
    %5 = arith.cmpf one, %1, %4 : vector<1x16x128xf32>
    %6 = arith.extui %5 : vector<1x16x128xi1> to vector<1x16x128xi32>
    %7 = arith.sitofp %6 : vector<1x16x128xi32> to vector<1x16x128xf32>
    %8 = arith.subf %1, %0 : vector<1x16x128xf32>
    %cst_8 = arith.constant 0.000000e+00 : f32
    %9 = vector.broadcast %cst_8 : f32 to vector<1x16x128xf32>
    %10 = arith.select %5, %8, %9 : vector<1x16x128xi1>, vector<1x16x128xf32>
    %11 = tpu.iota {dimensions = array<i32: 1>} : vector<1x16x128xi32>
    %c1_i32 = arith.constant 1 : i32
    %12 = vector.broadcast %c1_i32 : i32 to vector<1x16x128xi32>
    %13 = arith.cmpi sge, %11, %12 : vector<1x16x128xi32>
    %14 = arith.extui %13 : vector<1x16x128xi1> to vector<1x16x128xi32>
    %15 = arith.sitofp %14 : vector<1x16x128xi32> to vector<1x16x128xf32>
    %c2_i32 = arith.constant 2 : i32
    %16 = vector.broadcast %c2_i32 : i32 to vector<1x16x128xi32>
    %17 = arith.cmpi sge, %11, %16 : vector<1x16x128xi32>
    %18 = arith.extui %17 : vector<1x16x128xi1> to vector<1x16x128xi32>
    %19 = arith.sitofp %18 : vector<1x16x128xi32> to vector<1x16x128xf32>
    %cst_9 = arith.constant 0.000000e+00 : f32
    %20 = vector.broadcast %cst_9 : f32 to vector<1x16x128xf32>
    %c1_i32_10 = arith.constant 1 : i32
    %21 = tpu.dynamic_rotate %10 by %c1_i32_10 dim 2 : vector<1x16x128xf32>, i32 -> vector<1x16x128xf32>
    %c1_i32_11 = arith.constant 1 : i32
    %22 = tpu.dynamic_rotate %7 by %c1_i32_11 dim 2 : vector<1x16x128xf32>, i32 -> vector<1x16x128xf32>
    %23 = arith.subf %10, %21 : vector<1x16x128xf32>
    %24 = math.absf %23 : vector<1x16x128xf32>
    %25 = arith.mulf %24, %22 : vector<1x16x128xf32>
    %26 = arith.addf %20, %25 : vector<1x16x128xf32>
    %c2_i32_12 = arith.constant 2 : i32
    %27 = tpu.dynamic_rotate %10 by %c2_i32_12 dim 2 : vector<1x16x128xf32>, i32 -> vector<1x16x128xf32>
    %c2_i32_13 = arith.constant 2 : i32
    %28 = tpu.dynamic_rotate %7 by %c2_i32_13 dim 2 : vector<1x16x128xf32>, i32 -> vector<1x16x128xf32>
    %29 = arith.subf %10, %27 : vector<1x16x128xf32>
    %30 = math.absf %29 : vector<1x16x128xf32>
    %31 = arith.mulf %30, %28 : vector<1x16x128xf32>
    %32 = arith.addf %26, %31 : vector<1x16x128xf32>
    %c1_i32_14 = arith.constant 1 : i32
    %33 = tpu.dynamic_rotate %10 by %c1_i32_14 dim 1 : vector<1x16x128xf32>, i32 -> vector<1x16x128xf32>
    %c1_i32_15 = arith.constant 1 : i32
    %34 = tpu.dynamic_rotate %7 by %c1_i32_15 dim 1 : vector<1x16x128xf32>, i32 -> vector<1x16x128xf32>
    %35 = arith.mulf %34, %15 : vector<1x16x128xf32>
    %36 = arith.subf %10, %33 : vector<1x16x128xf32>
    %37 = math.absf %36 : vector<1x16x128xf32>
    %38 = arith.mulf %37, %35 : vector<1x16x128xf32>
    %39 = arith.addf %32, %38 : vector<1x16x128xf32>
    %c1_i32_16 = arith.constant 1 : i32
    %40 = tpu.dynamic_rotate %33 by %c1_i32_16 dim 2 : vector<1x16x128xf32>, i32 -> vector<1x16x128xf32>
    %c1_i32_17 = arith.constant 1 : i32
    %41 = tpu.dynamic_rotate %35 by %c1_i32_17 dim 2 : vector<1x16x128xf32>, i32 -> vector<1x16x128xf32>
    %42 = arith.subf %10, %40 : vector<1x16x128xf32>
    %43 = math.absf %42 : vector<1x16x128xf32>
    %44 = arith.mulf %43, %41 : vector<1x16x128xf32>
    %45 = arith.addf %39, %44 : vector<1x16x128xf32>
    %c127_i32 = arith.constant 127 : i32
    %46 = tpu.dynamic_rotate %33 by %c127_i32 dim 2 : vector<1x16x128xf32>, i32 -> vector<1x16x128xf32>
    %c127_i32_18 = arith.constant 127 : i32
    %47 = tpu.dynamic_rotate %35 by %c127_i32_18 dim 2 : vector<1x16x128xf32>, i32 -> vector<1x16x128xf32>
    %48 = arith.subf %10, %46 : vector<1x16x128xf32>
    %49 = math.absf %48 : vector<1x16x128xf32>
    %50 = arith.mulf %49, %47 : vector<1x16x128xf32>
    %51 = arith.addf %45, %50 : vector<1x16x128xf32>
    %c2_i32_19 = arith.constant 2 : i32
    %52 = tpu.dynamic_rotate %33 by %c2_i32_19 dim 2 : vector<1x16x128xf32>, i32 -> vector<1x16x128xf32>
    %c2_i32_20 = arith.constant 2 : i32
    %53 = tpu.dynamic_rotate %35 by %c2_i32_20 dim 2 : vector<1x16x128xf32>, i32 -> vector<1x16x128xf32>
    %54 = arith.subf %10, %52 : vector<1x16x128xf32>
    %55 = math.absf %54 : vector<1x16x128xf32>
    %56 = arith.mulf %55, %53 : vector<1x16x128xf32>
    %57 = arith.addf %51, %56 : vector<1x16x128xf32>
    %c126_i32 = arith.constant 126 : i32
    %58 = tpu.dynamic_rotate %33 by %c126_i32 dim 2 : vector<1x16x128xf32>, i32 -> vector<1x16x128xf32>
    %c126_i32_21 = arith.constant 126 : i32
    %59 = tpu.dynamic_rotate %35 by %c126_i32_21 dim 2 : vector<1x16x128xf32>, i32 -> vector<1x16x128xf32>
    %60 = arith.subf %10, %58 : vector<1x16x128xf32>
    %61 = math.absf %60 : vector<1x16x128xf32>
    %62 = arith.mulf %61, %59 : vector<1x16x128xf32>
    %63 = arith.addf %57, %62 : vector<1x16x128xf32>
    %c2_i32_22 = arith.constant 2 : i32
    %64 = tpu.dynamic_rotate %10 by %c2_i32_22 dim 1 : vector<1x16x128xf32>, i32 -> vector<1x16x128xf32>
    %c2_i32_23 = arith.constant 2 : i32
    %65 = tpu.dynamic_rotate %7 by %c2_i32_23 dim 1 : vector<1x16x128xf32>, i32 -> vector<1x16x128xf32>
    %66 = arith.mulf %65, %19 : vector<1x16x128xf32>
    %67 = arith.subf %10, %64 : vector<1x16x128xf32>
    %68 = math.absf %67 : vector<1x16x128xf32>
    %69 = arith.mulf %68, %66 : vector<1x16x128xf32>
    %70 = arith.addf %63, %69 : vector<1x16x128xf32>
    %c1_i32_24 = arith.constant 1 : i32
    %71 = tpu.dynamic_rotate %64 by %c1_i32_24 dim 2 : vector<1x16x128xf32>, i32 -> vector<1x16x128xf32>
    %c1_i32_25 = arith.constant 1 : i32
    %72 = tpu.dynamic_rotate %66 by %c1_i32_25 dim 2 : vector<1x16x128xf32>, i32 -> vector<1x16x128xf32>
    %73 = arith.subf %10, %71 : vector<1x16x128xf32>
    %74 = math.absf %73 : vector<1x16x128xf32>
    %75 = arith.mulf %74, %72 : vector<1x16x128xf32>
    %76 = arith.addf %70, %75 : vector<1x16x128xf32>
    %c127_i32_26 = arith.constant 127 : i32
    %77 = tpu.dynamic_rotate %64 by %c127_i32_26 dim 2 : vector<1x16x128xf32>, i32 -> vector<1x16x128xf32>
    %c127_i32_27 = arith.constant 127 : i32
    %78 = tpu.dynamic_rotate %66 by %c127_i32_27 dim 2 : vector<1x16x128xf32>, i32 -> vector<1x16x128xf32>
    %79 = arith.subf %10, %77 : vector<1x16x128xf32>
    %80 = math.absf %79 : vector<1x16x128xf32>
    %81 = arith.mulf %80, %78 : vector<1x16x128xf32>
    %82 = arith.addf %76, %81 : vector<1x16x128xf32>
    %c2_i32_28 = arith.constant 2 : i32
    %83 = tpu.dynamic_rotate %64 by %c2_i32_28 dim 2 : vector<1x16x128xf32>, i32 -> vector<1x16x128xf32>
    %c2_i32_29 = arith.constant 2 : i32
    %84 = tpu.dynamic_rotate %66 by %c2_i32_29 dim 2 : vector<1x16x128xf32>, i32 -> vector<1x16x128xf32>
    %85 = arith.subf %10, %83 : vector<1x16x128xf32>
    %86 = math.absf %85 : vector<1x16x128xf32>
    %87 = arith.mulf %86, %84 : vector<1x16x128xf32>
    %88 = arith.addf %82, %87 : vector<1x16x128xf32>
    %c126_i32_30 = arith.constant 126 : i32
    %89 = tpu.dynamic_rotate %64 by %c126_i32_30 dim 2 : vector<1x16x128xf32>, i32 -> vector<1x16x128xf32>
    %c126_i32_31 = arith.constant 126 : i32
    %90 = tpu.dynamic_rotate %66 by %c126_i32_31 dim 2 : vector<1x16x128xf32>, i32 -> vector<1x16x128xf32>
    %91 = arith.subf %10, %89 : vector<1x16x128xf32>
    %92 = math.absf %91 : vector<1x16x128xf32>
    %93 = arith.mulf %92, %90 : vector<1x16x128xf32>
    %94 = arith.addf %88, %93 : vector<1x16x128xf32>
    %95 = arith.mulf %94, %7 : vector<1x16x128xf32>
    %96 = math.absf %10 : vector<1x16x128xf32>
    %97 = arith.mulf %96, %3 : vector<1x16x128xf32>
    %cst_32 = arith.constant dense<0.000000e+00> : vector<1x16xf32>
    %98 = vector.multi_reduction <add>, %97, %cst_32 [2] : vector<1x16x128xf32> to vector<1x16xf32>
    %99 = vector.shape_cast %98 : vector<1x16xf32> to vector<1x16x1xf32>
    %cst_33 = arith.constant dense<0.000000e+00> : vector<1x1xf32>
    %100 = vector.multi_reduction <add>, %99, %cst_33 [1] : vector<1x16x1xf32> to vector<1x1xf32>
    %101 = vector.shape_cast %100 : vector<1x1xf32> to vector<1x1x1xf32>
    %cst_34 = arith.constant dense<0.000000e+00> : vector<1x1xf32>
    %102 = vector.multi_reduction <add>, %101, %cst_34 [0] : vector<1x1x1xf32> to vector<1x1xf32>
    %103 = arith.mulf %7, %3 : vector<1x16x128xf32>
    %cst_35 = arith.constant dense<0.000000e+00> : vector<1x16xf32>
    %104 = vector.multi_reduction <add>, %103, %cst_35 [2] : vector<1x16x128xf32> to vector<1x16xf32>
    %105 = vector.shape_cast %104 : vector<1x16xf32> to vector<1x16x1xf32>
    %cst_36 = arith.constant dense<0.000000e+00> : vector<1x1xf32>
    %106 = vector.multi_reduction <add>, %105, %cst_36 [1] : vector<1x16x1xf32> to vector<1x1xf32>
    %107 = vector.shape_cast %106 : vector<1x1xf32> to vector<1x1x1xf32>
    %cst_37 = arith.constant dense<0.000000e+00> : vector<1x1xf32>
    %108 = vector.multi_reduction <add>, %107, %cst_37 [0] : vector<1x1x1xf32> to vector<1x1xf32>
    %cst_38 = arith.constant dense<0.000000e+00> : vector<1x16xf32>
    %109 = vector.multi_reduction <add>, %7, %cst_38 [2] : vector<1x16x128xf32> to vector<1x16xf32>
    %110 = vector.shape_cast %109 : vector<1x16xf32> to vector<1x16x1xf32>
    %cst_39 = arith.constant dense<0.000000e+00> : vector<1x1xf32>
    %111 = vector.multi_reduction <add>, %110, %cst_39 [1] : vector<1x16x1xf32> to vector<1x1xf32>
    %112 = vector.shape_cast %111 : vector<1x1xf32> to vector<1x1x1xf32>
    %cst_40 = arith.constant dense<0.000000e+00> : vector<1x1xf32>
    %113 = vector.multi_reduction <add>, %112, %cst_40 [0] : vector<1x1x1xf32> to vector<1x1xf32>
    %cst_41 = arith.constant dense<0.000000e+00> : vector<1x16xf32>
    %114 = vector.multi_reduction <add>, %95, %cst_41 [2] : vector<1x16x128xf32> to vector<1x16xf32>
    %115 = vector.shape_cast %114 : vector<1x16xf32> to vector<1x16x1xf32>
    %cst_42 = arith.constant dense<0.000000e+00> : vector<1x1xf32>
    %116 = vector.multi_reduction <add>, %115, %cst_42 [1] : vector<1x16x1xf32> to vector<1x1xf32>
    %117 = vector.shape_cast %116 : vector<1x1xf32> to vector<1x1x1xf32>
    %cst_43 = arith.constant dense<0.000000e+00> : vector<1x1xf32>
    %118 = vector.multi_reduction <add>, %117, %cst_43 [0] : vector<1x1x1xf32> to vector<1x1xf32>
    %119 = tpu.iota {dimensions = array<i32: 0>} : vector<4x128xi32>
    %cst_44 = arith.constant 0.000000e+00 : f32
    %120 = vector.broadcast %cst_44 : f32 to vector<4x128xf32>
    %c0_i32 = arith.constant 0 : i32
    %121 = vector.broadcast %c0_i32 : i32 to vector<4x128xi32>
    %122 = arith.cmpi eq, %119, %121 : vector<4x128xi32>
    %cst_45 = arith.constant 0.000000e+00 : f32
    %123 = vector.shape_cast %102 : vector<1x1xf32> to vector<1x1xf32>
    %124 = vector.broadcast %123 : vector<1x1xf32> to vector<4x128xf32>
    %125 = vector.broadcast %cst_45 : f32 to vector<4x128xf32>
    %126 = arith.select %122, %124, %125 : vector<4x128xi1>, vector<4x128xf32>
    %127 = arith.addf %120, %126 : vector<4x128xf32>
    %c1_i32_46 = arith.constant 1 : i32
    %128 = vector.broadcast %c1_i32_46 : i32 to vector<4x128xi32>
    %129 = arith.cmpi eq, %119, %128 : vector<4x128xi32>
    %cst_47 = arith.constant 0.000000e+00 : f32
    %130 = vector.shape_cast %108 : vector<1x1xf32> to vector<1x1xf32>
    %131 = vector.broadcast %130 : vector<1x1xf32> to vector<4x128xf32>
    %132 = vector.broadcast %cst_47 : f32 to vector<4x128xf32>
    %133 = arith.select %129, %131, %132 : vector<4x128xi1>, vector<4x128xf32>
    %134 = arith.addf %127, %133 : vector<4x128xf32>
    %c2_i32_48 = arith.constant 2 : i32
    %135 = vector.broadcast %c2_i32_48 : i32 to vector<4x128xi32>
    %136 = arith.cmpi eq, %119, %135 : vector<4x128xi32>
    %cst_49 = arith.constant 0.000000e+00 : f32
    %137 = vector.shape_cast %113 : vector<1x1xf32> to vector<1x1xf32>
    %138 = vector.broadcast %137 : vector<1x1xf32> to vector<4x128xf32>
    %139 = vector.broadcast %cst_49 : f32 to vector<4x128xf32>
    %140 = arith.select %136, %138, %139 : vector<4x128xi1>, vector<4x128xf32>
    %141 = arith.addf %134, %140 : vector<4x128xf32>
    %c3_i32 = arith.constant 3 : i32
    %142 = vector.broadcast %c3_i32 : i32 to vector<4x128xi32>
    %143 = arith.cmpi eq, %119, %142 : vector<4x128xi32>
    %cst_50 = arith.constant 0.000000e+00 : f32
    %144 = vector.shape_cast %118 : vector<1x1xf32> to vector<1x1xf32>
    %145 = vector.broadcast %144 : vector<1x1xf32> to vector<4x128xf32>
    %146 = vector.broadcast %cst_50 : f32 to vector<4x128xf32>
    %147 = arith.select %143, %145, %146 : vector<4x128xi1>, vector<4x128xf32>
    %148 = arith.addf %141, %147 : vector<4x128xf32>
    %149 = vector.shape_cast %148 : vector<4x128xf32> to vector<1x4x128xf32>
    %c0_51 = arith.constant 0 : index
    %c0_52 = arith.constant 0 : index
    %c0_53 = arith.constant 0 : index
    %150 = vector.load %arg4[%c0_51, %c0_52, %c0_53] : memref<1x4x128xf32, #tpu.memory_space<vmem>>, vector<1x4x128xf32>
    tpu.vector_store %arg4[%c0_51, %c0_52, %c0_53], %149 {strides = array<i32>} : memref<1x4x128xf32, #tpu.memory_space<vmem>>, vector<1x4x128xf32>,
    return
  }
  func.func @transform_0(%arg0: i32) -> (i32, i32, i32) {
    %c0_i32 = arith.constant 0 : i32
    %c0_i32_0 = arith.constant 0 : i32
    %c0_i32_1 = arith.constant 0 : i32
    return %arg0, %c0_i32, %c0_i32_0 : i32, i32, i32
  }
  func.func @transform_1(%arg0: i32) -> (i32, i32, i32) {
    %c0_i32 = arith.constant 0 : i32
    %c0_i32_0 = arith.constant 0 : i32
    %c0_i32_1 = arith.constant 0 : i32
    return %arg0, %c0_i32, %c0_i32_0 : i32, i32, i32
  }
  func.func @transform_2(%arg0: i32) -> (i32, i32, i32) {
    %c0_i32 = arith.constant 0 : i32
    %c0_i32_0 = arith.constant 0 : i32
    %c0_i32_1 = arith.constant 0 : i32
    return %arg0, %c0_i32, %c0_i32_0 : i32, i32, i32
  }
  func.func @transform_3(%arg0: i32) -> (i32, i32, i32) {
    %c0_i32 = arith.constant 0 : i32
    %c0_i32_0 = arith.constant 0 : i32
    %c0_i32_1 = arith.constant 0 : i32
    return %arg0, %c0_i32, %c0_i32_0 : i32, i32, i32
  }
}

</mosaic_0001>

<bundles_post_ra>
// kernel: tpu_custom_call.1
= control target key start
LH: loop header
LB: loop body
LE: loop exit
PB: predicated region body
PF: predicated region fallthrough
CT: control target
= control target key end

     0   :  { %s1360_s0 = inlined_call_operand.hbm [shape: f32[2,16,128], index: 0, kind: input, shape index: {}]   ;;  %s1361_s1 = inlined_call_operand.hbm [shape: f32[2,16,128], index: 1, kind: input, shape index: {}]   ;;  %s1362_s2 = inlined_call_operand.hbm [shape: s8[2,16,128], index: 2, kind: input, shape index: {}]   ;;  %s1363_s3 = inlined_call_operand.hbm [shape: f32[2,4,128], index: 3, kind: output, shape index: {}]  }
   0x1   :  { %1368 = sst [smem:[#allocation12_spill]] %s1360_s0 }
   0x2   :  { %8 = vsyncpa [#allocation3], 0 }
   0x3   :  { %10 = vsyncpa [#allocation3 + $0x1], 0 }
   0x4   :  { %11 = vsyncpa [#allocation6], 0 }
   0x5   :  { %13 = vsyncpa [#allocation6 + $0x1], 0 }
   0x6   :  { %14 = vsyncpa [#allocation4], 0 }
   0x7   :  { %16 = vsyncpa [#allocation4 + $0x1], 0  ;;  %s994_s12 = smov 0   ;;  %s996_s13 = smov 0  }
   0x8   :  { %s998_s14 = smov 0   ;;  %s1000_s15 = smov 0  }
   0x9 LB: > { %s1015_s16 = sadd.s32 4294967295, %s959_s15   ;;  %s695_s17 = sadd.s32 4294967294, %s959_s15   ;;  %s959_s15 = sphi %s1000_s15, %s1387_s15   ;;  %s955_s14 = sphi %s998_s14, %s1386_s14   ;;  %s951_s13 = sphi %s996_s13, %s1385_s13   ;;  %s947_s12 = sphi %s994_s12, %s1384_s12  }
   0xa   : > { %s1019_s18 = sadd.s32 1, %s959_s15   ;;  %s29_s19 = sadd.s32 1, %s955_s14 }
   0xb   : > { %s26_s20 = ssub.s32 %s959_s15, %s1019_s18  ;;  %p36_p0 = scmp.ne.s32.totalorder %s955_s14, %s951_s13 }
   0xc   : > { %p27_p1 = scmp.eq.s32.totalorder %s26_s20, 0  ;;  %p37_p2 = scmp.eq.s32.totalorder %s959_s15, 0 }
   0xd   : > { %p42_p3 = scmp.ne.s32.totalorder %s951_s13, %s947_s12  ;;  %p43_p4 = scmp.eq.s32.totalorder %s1015_s16, 0 }
   0xe   : > { %s1031_s21 = scalar_select %p27_p1, %s955_s14, %s29_s19  }
   0xf   : > { %p38_p5 = por %p37_p2, %p36_p0  ;;  %p1033_p6 = por %p43_p4, %p42_p3 }
  0x10   : > { %p118_p7 = scmp.eq.s32.totalorder %s1015_s16, 1  ;;  %p124_p8 = scmp.eq.s32.totalorder %s695_s17, 1 }
  0x11   : > { %s1369_s22 = scalar_select %p1033_p6, 1, 0 }
  0x12   : > { %p749_p10 = scmp.lt.s32.totalorder %s959_s15, 2  ;;  %p1040_p11 = por %p118_p7, %p36_p0 }
  0x13   : > { %p1044_p12 = por %p124_p8, %p42_p3  ;;  %s1049_s25 = sand.u32 1, %s955_s14  }
  0x14   : > { %s1370_s23 = scalar_select %p1040_p11, 1, 0 }
  0x15   : > { %s1371_s24 = scalar_select %p1044_p12, 1, 0 }
  0x16   : > { %s720_s26 = sshll.u32 %s959_s15, 8  ;;  %s698_s27 = sshll.u32 %s1049_s25, 4 }
  0x17   : > { %p1053_p13 = pnand %p749_p10, %p38_p5  ;;  %s165_s29 = sand.u32 1, %s959_s15  }
  0x18   : > { %s1063_s5 = scalar_lea.hbm %s1361_s1, %s720_s26  ;;  %s169_s6 = scalar_lea.vmem [#allocation5], %s698_s27 }
  0x19   : > { %s176_s7 = sshll.u32 %s169_s6, 4  ;;  %s1070_s8 = scalar_lea.sflag [#allocation6], %s165_s29  ;;  %s1067_s7 = int_to_ptr.vmem [resolvable:$true] %s176_s7 }
  0x1a   : > { %s807_s9 = scalar_lea.hbm %s1063_s5, 256  ;;  %p1076_p2 = pneg %p1053_p13 }
  0x1b   : > { %p808_p1 = scmp.ne.s32.totalorder %s1063_s5, %s807_s9  ;;  %s812_s19 = scalar_lea.hbm %s1361_s1, 512 }
  0x1c   : > { %p813_p5 = scmp.lt.s32.totalorder %s1063_s5, %s1361_s1  ;;  %p814_p7 = scmp.lt.s32.totalorder %s812_s19, %s807_s9 }
  0x1d   : > { %p810_p3 = pnand %p1076_p2, %p808_p1 }
  0x1e   : > { %p815_p8 = por %p814_p7, %p813_p5 }
  0x1f   : > { %p811_p4 = pneg %p810_p3 }
  0x21   : > { %p816_p10 = pnand %p815_p8, %p811_p4 }
  0x23   : > { %819 = shalt.err (!%p816_p10)
}
  0x24   : > { %s820_s29 = scalar_lea.vmem %s1067_s7, 256  ;;  %s961_s4 = smov [#allocation5]  }
  0x25   : > { %p821_p9 = scmp.ne.s32.totalorder %s1067_s7, %s820_s29  ;;  %s825_s6 = sshll.u32 %s961_s4, 4  ;;  %s826_s6 = int_to_ptr.vmem [resolvable:$false] %s825_s6 }
  0x26   : > { %s827_s11 = scalar_lea.vmem %s826_s6, 512  ;;  %p828_p0 = scmp.lt.s32.totalorder %s1067_s7, %s826_s6 }
  0x27   : > { %p823_p1 = pnand %p821_p9, %p1076_p2  ;;  %p829_p12 = scmp.lt.s32.totalorder %s827_s11, %s820_s29 }
  0x29   : > { %p824_p3 = pneg %p823_p1  ;;  %p830_p11 = por %p829_p12, %p828_p0 }
  0x2b   : > { %p831_p6 = pnand %p830_p11, %p824_p3 }
  0x2d   : > { %834 = shalt.err (!%p831_p6)
}
  0x2e   : > { %s1366_s9 = smov 128   ;;  %s1367_s17 = smov 8  }
  0x2f   : > { %741 = dma.hbm_to_vmem [thread:$0]  (!%p1053_p13), %s1063_s5, 256, %s1067_s7, %s1070_s8, %s1366_s9, %s1366_s9, %s1367_s17  }
  0x30   : > { %p205_p9 = scmp.lt.s32.totalorder %s959_s15, 3  ;;  %s1374_s0 = sld [smem:[#allocation12_spill]] }
  0x31   : > { %p1375_p6 = scmp.ge.s32.totalorder %s959_s15, 1  ;;  %s148_s4 = scalar_lea.vmem [#allocation2], %s698_s27 }
  0x32   : > { %s155_s6 = sshll.u32 %s148_s4, 4  ;;  %s704_s5 = sshll.u32 %s1049_s25, 2  ;;  %s1118_s6 = int_to_ptr.vmem [resolvable:$true] %s155_s6 }
  0x33   : > { %p1112_p11 = pnand %p1375_p6, %p205_p9  ;;  %s145_s7 = scalar_lea.sflag [#allocation3], %s1049_s25 }
  0x35   : > { %s1376_s29 = scalar_select %p1112_p11, 1, 0 }
  0x36   : > { %s1108_s30 = scalar_lea.hbm %s1374_s0, %s720_s26  ;;  %s840_s20 = scalar_lea.hbm %s1374_s0, 512 }
  0x37   : > { %s835_s11 = scalar_lea.hbm %s1108_s30, 256  ;;  %p841_p5 = scmp.lt.s32.totalorder %s1108_s30, %s1374_s0 }
  0x38   : > { %p836_p12 = scmp.ne.s32.totalorder %s1108_s30, %s835_s11  ;;  %p842_p7 = scmp.lt.s32.totalorder %s840_s20, %s835_s11 }
  0x3a   : > { %p838_p0 = pnand %p836_p12, %p1076_p2  ;;  %p843_p8 = por %p842_p7, %p841_p5 }
  0x3c   : > { %p839_p4 = pneg %p838_p0 }
  0x3e   : > { %p844_p10 = pnand %p843_p8, %p839_p4 }
  0x40   : > { %847 = shalt.err (!%p844_p10)
}
  0x41   : > { %s848_s27 = scalar_lea.vmem %s1118_s6, 256  ;;  %s964_s4 = smov [#allocation2]  }
  0x42   : > { %p849_p1 = scmp.ne.s32.totalorder %s1118_s6, %s848_s27  ;;  %s853_s26 = sshll.u32 %s964_s4, 4  ;;  %s854_s26 = int_to_ptr.vmem [resolvable:$false] %s853_s26 }
  0x43   : > { %s855_s19 = scalar_lea.vmem %s854_s26, 512  ;;  %p856_p6 = scmp.lt.s32.totalorder %s1118_s6, %s854_s26 }
  0x44   : > { %p851_p3 = pnand %p849_p1, %p1076_p2  ;;  %p857_p12 = scmp.lt.s32.totalorder %s855_s19, %s848_s27 }
  0x46   : > { %p852_p9 = pneg %p851_p3  ;;  %p858_p0 = por %p857_p12, %p856_p6 }
  0x48   : > { %p859_p11 = pnand %p858_p0, %p852_p9 }
  0x4a   : > { %862 = shalt.err (!%p859_p11)
}
  0x4b   : > { %s1377_s9 = smov 8   ;;  %s1378_s17 = smov 128  }
  0x4c   : > { %738 = dma.hbm_to_vmem [thread:$0]  (!%p1053_p13), %s1108_s30, 256, %s1118_s6, %s145_s7, %s1378_s17, %s1378_s17, %s1377_s9  }
  0x4d   : > { %s722_s11 = sshll.u32 %s959_s15, 6  ;;  %s190_s27 = scalar_lea.vmem [#allocation7], %s704_s5 }
  0x4e   : > { %s1149_s26 = scalar_lea.hbm %s1362_s2, %s722_s11  ;;  %s197_s19 = sshll.u32 %s190_s27, 4  ;;  %s1153_s19 = int_to_ptr.vmem [resolvable:$true] %s197_s19 }
  0x4f   : > { %s863_s0 = scalar_lea.hbm %s1149_s26, 64  ;;  %s868_s7 = scalar_lea.hbm %s1362_s2, 128 }
  0x50   : > { %p864_p11 = scmp.ne.s32.totalorder %s1149_s26, %s863_s0  ;;  %p869_p7 = scmp.lt.s32.totalorder %s1149_s26, %s1362_s2 }
  0x51   : > { %p870_p8 = scmp.lt.s32.totalorder %s868_s7, %s863_s0 }
  0x52   : > { %p866_p4 = pnand %p864_p11, %p1076_p2 }
  0x53   : > { %p871_p10 = por %p870_p8, %p869_p7 }
  0x54   : > { %p867_p5 = pneg %p866_p4 }
  0x56   : > { %p872_p1 = pnand %p871_p10, %p867_p5 }
  0x58   : > { %875 = shalt.err (!%p872_p1)
}
  0x59   : > { %s876_s25 = scalar_lea.vmem %s1153_s19, 64  ;;  %s965_s5 = smov [#allocation7]  }
  0x5a   : > { %p877_p3 = scmp.ne.s32.totalorder %s1153_s19, %s876_s25  ;;  %s881_s11 = sshll.u32 %s965_s5, 4  ;;  %s882_s11 = int_to_ptr.vmem [resolvable:$false] %s881_s11 }
  0x5b   : > { %s883_s20 = scalar_lea.vmem %s882_s11, 128  ;;  %p884_p12 = scmp.lt.s32.totalorder %s1153_s19, %s882_s11 }
  0x5c   : > { %p879_p9 = pnand %p877_p3, %p1076_p2  ;;  %p885_p0 = scmp.lt.s32.totalorder %s883_s20, %s876_s25 }
  0x5e   : > { %p880_p6 = pneg %p879_p9  ;;  %p886_p11 = por %p885_p0, %p884_p12 }
  0x60   : > { %p887_p4 = pnand %p886_p11, %p880_p6 }
  0x62   : > { %890 = shalt.err (!%p887_p4)
}
  0x63   : > { %s966_s0 = smov 32   ;;  %s967_s4 = smov 2  }
  0x64   : > { %744 = dma.hbm_to_vmem [thread:$0]  (!%p1053_p13), %s1149_s26, 64, %s1153_s19, %s1070_s8, %s966_s0, %s966_s0, %s967_s4  }
  0x65   : > { %p1379_p2 = scmp.ne.s32.totalorder %s1376_s29, 0 }
  0x66   : > { %s1179_s10 = sand.u32 (!%p1379_p2), 1, %s951_s13   ;;  %p1380_p5 = scmp.ne.s32.totalorder (!%p1379_p2), %s1369_s22, 0 }
  0x67   : > { %209 = sbr.rel (%p1379_p2) target bundleno = 478 (0x1de), region = 32  ;;  %s708_s27 = sshll.u32 (!%p1379_p2), %s1179_s10, 4 }
  0x68   : > { %s212_s30 = scalar_lea.sflag (!%p1379_p2), [#allocation3], %s1179_s10  ;;  %s215_s6 = scalar_lea.vmem (!%p1379_p2), [#allocation2], %s708_s27 }
  0x6c   : > { %934 = dma.done.wait (%p1380_p5), %s212_s30, 256  }
  0x6d   : > { %936 = vsyncadd (%p1380_p5), %s212_s30, 4294967040  ;;  %s220_s28 = sand.u32 1, %s1015_s16   ;;  %s224_s29 = scalar_lea.vmem [#allocation5], %s708_s27 }
  0x6e   : > { %s221_s8 = scalar_lea.sflag [#allocation6], %s220_s28 }
  0x6f   : > { %938 = dma.done.wait (%p1380_p5), %s221_s8, 320  }
  0x70   : > { %940 = vsyncadd (%p1380_p5), %s221_s8, 4294966976  ;;  %v286_v0 = vlaneseq  ;;  %v268_v1 = vld [vmem:[%s224_s29] sm:$0xff]  ;;  %v269_v2 = vld [vmem:[%s224_s29 + $0x8] sm:$0xff]  ;;  %v968_v7 = vmov 0.0   ;;  %s969_s22 = smov 2   ;;  %s970_s26 = smov 1  }
  0x71   : > { %v266_v3 = vld [vmem:[%s215_s6] sm:$0xff]  ;;  %vm276_vm0 = vcmp.ne.f32.partialorder %v268_v1, 0.0  ;;  %vm277_vm1 = vcmp.ne.f32.partialorder %v269_v2, 0.0  ;;  %v267_v4 = vld [vmem:[%s215_s6 + $0x8] sm:$0xff]  ;;  %s971_s19 = smov 127   ;;  %s972_s7 = smov 126  }
  0x72   : > { %v282_v5 = vsub.f32 %v268_v1, %v266_v3  ;;  %v1192_v6 = vshrl.u32 %v286_v0, 7  ;;  %v1194_v8 = vsel %vm276_vm0, 1.0, %v968_v7  ;;  %v1196_v9 = vsel %vm277_vm1, 1.0, %v968_v7  ;;  %s710_s9 = sshll.u32 %s1179_s10, 2  ;;  %s717_s25 = sshll.u32 %s1015_s16, 6 }
  0x73   : > { %v283_v10 = vsub.f32 %v269_v2, %v267_v4  ;;  %v797_v11 = vpack.i.bf16 %v1196_v9, %v1194_v8  ;;  %v338_v15 = vrot.slane %v1194_v8, 7  ;;  %v339_v16 = vrot.slane %v1196_v9, 7  ;;  %s233_s17 = scalar_lea.vmem [#allocation7], %s710_s9  ;;  %s265_s5 = scalar_lea.vmem [#allocation8], %s710_s9 }
  0x74   : > { %v1200_v12 = vsel %vm276_vm0, %v282_v5, 0.0  ;;  %vm335_vm2 = vcmp.lt.s32.totalorder %v1192_v6, 1  ;;  %vm289_vm3 = vcmp.ge.s32.totalorder %v1192_v6, 1  ;;  %v421_v30 = vrot.slane %v1194_v8, 6  ;;  %v724_v44 = vld [vmem:[%s233_s17] sm:$0xf]   ;;  %s580_s4 = scalar_lea.hbm %s1363_s3, %s717_s25 }
  0x75   : > { %v1202_v13 = vsel %vm277_vm1, %v283_v10, 0.0  ;;  %v333_v14 = vrot.slane %v1200_v12, 7  ;;  %798 = vrot.lane.b32.xlu1 %v797_v11, %s969_s22  ;;  %793 = vrot.lane.b32.xlu0 %v797_v11, %s970_s26  ;;  %v714_v20 = vsel %vm289_vm3, 1.0, %v968_v7  ;;  %v341_v21 = vsel %vm335_vm2, %v339_v16, %v338_v15  ;;  %s582_s11 = sshll.u32 %s265_s5, 4  ;;  %s569_s27 = scalar_lea.sflag [#allocation4], %s1179_s10  ;;  %s583_s11 = int_to_ptr.vmem [resolvable:$true] %s582_s11 }
  0x76   : > { %v334_v17 = vrot.slane %v1202_v13, 7  ;;  %v342_v24 = vmul.f32 %v714_v20, %v341_v21  ;;  %v340_v27 = vsel %vm335_vm2, %v338_v15, %v339_v16  ;;  %v422_v31 = vrot.slane %v1196_v9, 6  ;;  %s891_s30 = scalar_lea.vmem %s583_s11, 64  ;;  %p1381_p7 = scmp.ne.s32.totalorder %s1370_s23, 0 }
  0x77   : > { %vm418_vm4 = vcmp.lt.s32.totalorder %v1192_v6, 2  ;;  %v416_v34 = vrot.slane %v1200_v12, 6  ;;  %v417_v35 = vrot.slane %v1202_v13, 6  ;;  %vm295_vm5 = vcmp.ge.s32.totalorder %v1192_v6, 2  ;;  %p892_p13 = scmp.ne.s32.totalorder %s583_s11, %s891_s30  ;;  %s973_s6 = smov [#allocation8]  }
  0x78   : > { %v337_v18 = vsel %vm335_vm2, %v334_v17, %v333_v14  ;;  %v336_v19 = vsel %vm335_vm2, %v333_v14, %v334_v17  ;;  %v1233_v32 = vsel %vm418_vm4, %v421_v30, %v422_v31  ;;  %v715_v37 = vsel %vm295_vm5, 1.0, %v968_v7  ;;  %s895_s16 = sshll.u32 %s973_s6, 4  ;;  %s896_s16 = int_to_ptr.vmem [resolvable:$false] %s895_s16 }
  0x79   : > { %317 = vrot.lane.b32.xlu1 %v1200_v12, %s969_s22  ;;  %301 = vrot.lane.b32.xlu0 %v1200_v12, %s970_s26  ;;  %v344_v22 = vsub.f32 %v1200_v12, %v337_v18  ;;  %v345_v23 = vsub.f32 %v1202_v13, %v336_v19  ;;  %v802_v33 = vpack.i.bf16 %v1233_v32, %v340_v27  ;;  %v726_v45 = vunpack.c.1.s8 %v724_v44  ;;  %p893_p8 = pnand %p892_p13, %p1381_p7  ;;  %s897_s28 = scalar_lea.vmem %s896_s16, 128 }
  0x7a   : > { %v420_v36 = vsel %vm418_vm4, %v417_v35, %v416_v34  ;;  %v424_v38 = vsel %vm418_vm4, %v422_v31, %v421_v30  ;;  %v1258_v43 = vsel %vm418_vm4, %v416_v34, %v417_v35  ;;  %v725_v46 = vunpack.c.0.s8 %v724_v44  ;;  %p898_p1 = scmp.lt.s32.totalorder %s583_s11, %s896_s16  ;;  %p899_p3 = scmp.lt.s32.totalorder %s897_s28, %s891_s30 }
  0x7b   : > { %v346_v25 = vand.u32 2147483647, %v344_v22  ;;  %v347_v26 = vand.u32 2147483647, %v345_v23  ;;  %v427_v39 = vsub.f32 %v1200_v12, %v420_v36  ;;  %v425_v40 = vmul.f32 %v715_v37, %v424_v38  ;;  %p894_p10 = pneg %p893_p8 }
  0x7c   : > { %v275_v47 = vcvt.s32.f32 %v726_v45  ;;  %v502_v48 = vand.u32 2147483647, %v1202_v13  ;;  %v274_v49 = vcvt.s32.f32 %v725_v46  ;;  %v501_v50 = vand.u32 2147483647, %v1200_v12  ;;  %p900_p9 = por %p899_p3, %p898_p1 }
  0x7d   : > { %319 = vrot.lane.b32.xlu1 %v1202_v13, %s969_s22  ;;  %303 = vrot.lane.b32.xlu0 %v1202_v13, %s970_s26  ;;  %v1222_v28 = vmul.f32 %v346_v25, %v342_v24  ;;  %v1224_v29 = vmul.f32 %v347_v26, %v340_v27  ;;  %v429_v41 = vand.u32 2147483647, %v427_v39  ;;  %vm555_vm6 = vcmp.eq.s32.totalorder %v1192_v6, 0 }
  0x7e   : > { %v504_v51 = vmul.f32 %v502_v48, %v275_v47  ;;  %v503_v52 = vmul.f32 %v501_v50, %v274_v49  ;;  %v517_v53 = vmul.f32 %v1194_v8, %v274_v49  ;;  %v518_v54 = vmul.f32 %v1196_v9, %v275_v47  ;;  %p901_p6 = pnand %p900_p9, %p894_p10 }
  0x7f   : > { %v1252_v42 = vmul.f32 %v429_v41, %v425_v40  ;;  %v428_v47 = vsub.f32 %v1202_v13, %v1258_v43  ;;  %vm558_vm7 = vcmp.eq.s32.totalorder %v1192_v6, 1  ;;  %vm561_vm8 = vcmp.eq.s32.totalorder %v1192_v6, 2 }
  0x80   : > { %vm564_vm9 = vcmp.eq.s32.totalorder %v1192_v6, 3 }
  0x81   : > { %352 = vrot.lane.b32.xlu0 %v337_v18, %s970_s26  ;;  %354 = vrot.lane.b32.xlu1 %v336_v19, %s970_s26 }
  0x85   : > { %368 = vrot.lane.b32.xlu0 %v337_v18, %s971_s19  ;;  %370 = vrot.lane.b32.xlu1 %v336_v19, %s971_s19 }
  0x89   : > { %356 = vrot.lane.b32.xlu0 %v342_v24, %s970_s26  ;;  %803 = vrot.lane.b32.xlu1 %v802_v33, %s970_s26 }
  0x8d   : > { %384 = vrot.lane.b32.xlu0 %v337_v18, %s969_s22  ;;  %386 = vrot.lane.b32.xlu1 %v336_v19, %s969_s22 }
  0x91   : > { %372 = vrot.lane.b32.xlu0 %v342_v24, %s971_s19  ;;  %374 = vrot.lane.b32.xlu1 %v340_v27, %s971_s19 }
  0x95   : > { %400 = vrot.lane.b32.xlu0 %v337_v18, %s972_s7  ;;  %402 = vrot.lane.b32.xlu1 %v336_v19, %s972_s7 }
  0x99   : > { %388 = vrot.lane.b32.xlu0 %v342_v24, %s969_s22  ;;  %390 = vrot.lane.b32.xlu1 %v340_v27, %s969_s22 }
  0x9d   : > { %404 = vrot.lane.b32.xlu0 %v342_v24, %s972_s7  ;;  %406 = vrot.lane.b32.xlu1 %v340_v27, %s972_s7 }
  0xa1   : > { %435 = vrot.lane.b32.xlu0 %v420_v36, %s970_s26  ;;  %437 = vrot.lane.b32.xlu1 %v1258_v43, %s970_s26 }
  0xa5   : > { %451 = vrot.lane.b32.xlu0 %v420_v36, %s971_s19  ;;  %453 = vrot.lane.b32.xlu1 %v1258_v43, %s971_s19 }
  0xa9   : > { %439 = vrot.lane.b32.xlu0 %v425_v40, %s970_s26  ;;  %467 = vrot.lane.b32.xlu1 %v420_v36, %s969_s22 }
  0xad   : > { %469 = vrot.lane.b32.xlu0 %v1258_v43, %s969_s22  ;;  %455 = vrot.lane.b32.xlu1 %v425_v40, %s971_s19 }
  0xb1   : > { %457 = vrot.lane.b32.xlu0 %v1233_v32, %s971_s19  ;;  %483 = vrot.lane.b32.xlu1 %v420_v36, %s972_s7 }
  0xb5   : > { %485 = vrot.lane.b32.xlu0 %v1258_v43, %s972_s7  ;;  %471 = vrot.lane.b32.xlu1 %v425_v40, %s969_s22 }
  0xb9   : > { %473 = vrot.lane.b32.xlu0 %v1233_v32, %s969_s22  ;;  %487 = vrot.lane.b32.xlu1 %v425_v40, %s972_s7 }
  0xbd   : > { %489 = vrot.lane.b32.xlu0 %v1233_v32, %s972_s7 }
  0xdc   : > { %507 = vadd.xlane.f32.xlu0 %v504_v51 }
  0xdd   : > { %505 = vadd.xlane.f32.xlu1 %v503_v52 }
  0xe0   : > { %519 = vadd.xlane.f32.xlu0 %v517_v53 }
  0xe1   : > { %521 = vadd.xlane.f32.xlu1 %v518_v54 }
  0xe4   : > { %531 = vadd.xlane.f32.xlu0 %v1194_v8 }
  0xe5   : > { %533 = vadd.xlane.f32.xlu1 %v1196_v9 }
  0xe7   : > { %v799_v55 = vpop.permute.xlu1 %798  ;;  %v794_v56 = vpop.permute.xlu0 %793 }
  0xe8   : > { %v800_v16 = vunpack.i.l.bf16 %v799_v55  ;;  %v801_v17 = vunpack.i.h.bf16 %v799_v55  ;;  %v796_v18 = vunpack.i.h.bf16 %v794_v56  ;;  %v795_v19 = vunpack.i.l.bf16 %v794_v56 }
  0xeb   : > { %v318_v57 = vpop.permute.xlu1 %317  ;;  %v302_v58 = vpop.permute.xlu0 %301 }
  0xec   : > { %v325_v1 = vsub.f32 %v1200_v12, %v318_v57  ;;  %v309_v2 = vsub.f32 %v1200_v12, %v302_v58 }
  0xee   : > { %v327_v10 = vand.u32 2147483647, %v325_v1  ;;  %v311_v11 = vand.u32 2147483647, %v309_v2 }
  0xef   : > { %v320_v59 = vpop.permute.xlu1 %319  ;;  %v304_v60 = vpop.permute.xlu0 %303 }
  0xf0   : > { %v326_v3 = vsub.f32 %v1202_v13, %v320_v59  ;;  %v310_v4 = vsub.f32 %v1202_v13, %v304_v60  ;;  %v329_v22 = vmul.f32 %v800_v16, %v327_v10  ;;  %v313_v23 = vmul.f32 %v795_v19, %v311_v11 }
  0xf2   : > { %v328_v14 = vand.u32 2147483647, %v326_v3  ;;  %v312_v15 = vand.u32 2147483647, %v310_v4  ;;  %v331_v36 = vadd.f32 %v329_v22, %v313_v23 }
  0xf3   : > { %v353_v61 = vpop.permute.xlu0 %352  ;;  %v355_v62 = vpop.permute.xlu1 %354 }
  0xf4   : > { %v330_v24 = vmul.f32 %v801_v17, %v328_v14  ;;  %v314_v25 = vmul.f32 %v796_v18, %v312_v15  ;;  %v360_v26 = vsub.f32 %v1200_v12, %v353_v61  ;;  %v361_v27 = vsub.f32 %v1202_v13, %v355_v62 }
  0xf5   : > { %v350_v52 = vadd.f32 %v1222_v28, %v331_v36  ;;  %v430_v62 = vand.u32 2147483647, %v428_v47 }
  0xf6   : > { %v332_v37 = vadd.f32 %v330_v24, %v314_v25  ;;  %v362_v38 = vand.u32 2147483647, %v360_v26  ;;  %v363_v40 = vand.u32 2147483647, %v361_v27 }
  0xf7   : > { %v369_v63 = vpop.permute.xlu0 %368  ;;  %v371_v0 = vpop.permute.xlu1 %370 }
  0xf8   : > { %v376_v33 = vsub.f32 %v1200_v12, %v369_v63  ;;  %v377_v34 = vsub.f32 %v1202_v13, %v371_v0  ;;  %v351_v54 = vadd.f32 %v1224_v29, %v332_v37 }
  0xfa   : > { %v378_v48 = vand.u32 2147483647, %v376_v33  ;;  %v379_v49 = vand.u32 2147483647, %v377_v34 }
  0xfb   : > { %v357_v5 = vpop.permute.xlu0 %356  ;;  %v1291_v7 = vpop.permute.xlu1 %803 }
  0xfc   : > { %v805_v35 = vunpack.i.l.bf16 %v1291_v7  ;;  %v364_v44 = vmul.f32 %v362_v38, %v357_v5  ;;  %v432_v5 = vmul.f32 %v430_v62, %v1233_v32 }
  0xfe   : > { %v365_v50 = vmul.f32 %v805_v35, %v363_v40  ;;  %v366_v59 = vadd.f32 %v364_v44, %v350_v52 }
  0xff   : > { %v385_v20 = vpop.permute.xlu0 %384  ;;  %v387_v21 = vpop.permute.xlu1 %386 }
 0x100   : > { %v392_v39 = vsub.f32 %v1200_v12, %v385_v20  ;;  %v393_v41 = vsub.f32 %v1202_v13, %v387_v21  ;;  %v367_v43 = vadd.f32 %v365_v50, %v351_v54 }
 0x102   : > { %v394_v53 = vand.u32 2147483647, %v392_v39  ;;  %v395_v55 = vand.u32 2147483647, %v393_v41  ;;  %v806_v41 = vunpack.i.h.bf16 %v1291_v7 }
 0x103   : > { %v373_v30 = vpop.permute.xlu0 %372  ;;  %v375_v31 = vpop.permute.xlu1 %374 }
 0x104   : > { %v380_v56 = vmul.f32 %v378_v48, %v373_v30  ;;  %v381_v57 = vmul.f32 %v379_v49, %v375_v31 }
 0x106   : > { %v382_v2 = vadd.f32 %v380_v56, %v366_v59  ;;  %v383_v3 = vadd.f32 %v381_v57, %v367_v43 }
 0x107   : > { %v401_v45 = vpop.permute.xlu0 %400  ;;  %v403_v46 = vpop.permute.xlu1 %402 }
 0x108   : > { %v409_v51 = vsub.f32 %v1202_v13, %v403_v46  ;;  %v408_v58 = vsub.f32 %v1200_v12, %v401_v45 }
 0x10a   : > { %v411_v63 = vand.u32 2147483647, %v409_v51  ;;  %v410_v4 = vand.u32 2147483647, %v408_v58 }
 0x10b   : > { %v389_v60 = vpop.permute.xlu0 %388  ;;  %v391_v61 = vpop.permute.xlu1 %390 }
 0x10c   : > { %v396_v0 = vmul.f32 %v394_v53, %v389_v60  ;;  %v397_v1 = vmul.f32 %v395_v55, %v391_v61 }
 0x10e   : > { %v398_v10 = vadd.f32 %v396_v0, %v382_v2  ;;  %v399_v11 = vadd.f32 %v397_v1, %v383_v3 }
 0x10f   : > { %v405_v28 = vpop.permute.xlu0 %404  ;;  %v407_v29 = vpop.permute.xlu1 %406 }
 0x110   : > { %v412_v14 = vmul.f32 %v410_v4, %v405_v28  ;;  %v413_v15 = vmul.f32 %v411_v63, %v407_v29 }
 0x112   : > { %v414_v16 = vadd.f32 %v412_v14, %v398_v10  ;;  %v415_v17 = vadd.f32 %v413_v15, %v399_v11 }
 0x113   : > { %v436_v18 = vpop.permute.xlu0 %435  ;;  %v438_v19 = vpop.permute.xlu1 %437 }
 0x114   : > { %v434_v20 = vadd.f32 %v432_v5, %v415_v17  ;;  %v433_v21 = vadd.f32 %v1252_v42, %v414_v16  ;;  %v443_v26 = vsub.f32 %v1200_v12, %v436_v18  ;;  %v444_v32 = vsub.f32 %v1202_v13, %v438_v19 }
 0x116   : > { %v445_v33 = vand.u32 2147483647, %v443_v26  ;;  %v446_v35 = vand.u32 2147483647, %v444_v32 }
 0x117   : > { %v452_v22 = vpop.permute.xlu0 %451  ;;  %v454_v23 = vpop.permute.xlu1 %453 }
 0x118   : > { %v459_v31 = vsub.f32 %v1200_v12, %v452_v22  ;;  %v460_v42 = vsub.f32 %v1202_v13, %v454_v23  ;;  %v448_v47 = vmul.f32 %v806_v41, %v446_v35 }
 0x11a   : > { %v461_v38 = vand.u32 2147483647, %v459_v31  ;;  %v462_v50 = vand.u32 2147483647, %v460_v42  ;;  %v450_v59 = vadd.f32 %v448_v47, %v434_v20 }
 0x11b   : > { %v440_v24 = vpop.permute.xlu0 %439  ;;  %v468_v25 = vpop.permute.xlu1 %467 }
 0x11c   : > { %v475_v34 = vsub.f32 %v1200_v12, %v468_v25  ;;  %v447_v39 = vmul.f32 %v445_v33, %v440_v24 }
 0x11e   : > { %v477_v44 = vand.u32 2147483647, %v475_v34  ;;  %v449_v51 = vadd.f32 %v447_v39, %v433_v21 }
 0x11f   : > { %v470_v27 = vpop.permute.xlu0 %469  ;;  %v456_v30 = vpop.permute.xlu1 %455 }
 0x120   : > { %v476_v45 = vsub.f32 %v1202_v13, %v470_v27  ;;  %v463_v46 = vmul.f32 %v461_v38, %v456_v30 }
 0x122   : > { %v478_v54 = vand.u32 2147483647, %v476_v45  ;;  %v465_v55 = vadd.f32 %v463_v46, %v449_v51 }
 0x123   : > { %v458_v36 = vpop.permute.xlu0 %457  ;;  %v484_v37 = vpop.permute.xlu1 %483 }
 0x124   : > { %v491_v40 = vsub.f32 %v1200_v12, %v484_v37  ;;  %v464_v56 = vmul.f32 %v462_v50, %v458_v36 }
 0x126   : > { %v493_v52 = vand.u32 2147483647, %v491_v40  ;;  %v466_v62 = vadd.f32 %v464_v56, %v450_v59 }
 0x127   : > { %v486_v48 = vpop.permute.xlu0 %485  ;;  %v472_v49 = vpop.permute.xlu1 %471 }
 0x128   : > { %v479_v53 = vmul.f32 %v477_v44, %v472_v49  ;;  %v492_v57 = vsub.f32 %v1202_v13, %v486_v48 }
 0x12a   : > { %v481_v7 = vadd.f32 %v479_v53, %v465_v55  ;;  %v494_v43 = vand.u32 2147483647, %v492_v57 }
 0x12b   : > { %v474_v58 = vpop.permute.xlu0 %473  ;;  %v488_v12 = vpop.permute.xlu1 %487 }
 0x12c   : > { %v480_v60 = vmul.f32 %v478_v54, %v474_v58  ;;  %v495_v61 = vmul.f32 %v493_v52, %v488_v12 }
 0x12e   : > { %v497_v63 = vadd.f32 %v495_v61, %v481_v7  ;;  %v482_v1 = vadd.f32 %v480_v60, %v466_v62 }
 0x12f   : > { %v490_v0 = vpop.permute.xlu0 %489 }
 0x130   : > { %v496_v2 = vmul.f32 %v494_v43, %v490_v0  ;;  %v499_v3 = vmul.f32 %v1194_v8, %v497_v63 }
 0x132   : > { %v498_v4 = vadd.f32 %v496_v2, %v482_v1  ;;  %543 = vadd.xlane.f32.xlu0 %v499_v3 }
 0x134   : > { %v500_v28 = vmul.f32 %v1196_v9, %v498_v4 }
 0x136   : > { %545 = vadd.xlane.f32.xlu1 %v500_v28 }
 0x165   : > { %v508_v13 = vpop.xlane.xlu0 %507 }
 0x166   : > { %v506_v5 = vpop.xlane.xlu1 %505 }
 0x167   : > { %v509_v11 = vadd.f32 %v508_v13, %v506_v5 }
 0x169   : > { %v520_v29 = vpop.xlane.xlu0 %519  ;;  %v510_v17 = vrot.slane %v509_v11, 4 }
 0x16a   : > { %v522_v10 = vpop.xlane.xlu1 %521 }
 0x16b   : > { %v523_v14 = vadd.f32 %v522_v10, %v520_v29  ;;  %v511_v20 = vadd.f32 %v510_v17, %v509_v11 }
 0x16d   : > { %v532_v15 = vpop.xlane.xlu0 %531  ;;  %v524_v18 = vrot.slane %v523_v14, 4  ;;  %v512_v8 = vrot.slane %v511_v20, 2 }
 0x16e   : > { %v534_v16 = vpop.xlane.xlu1 %533 }
 0x16f   : > { %v535_v19 = vadd.f32 %v534_v16, %v532_v15  ;;  %v525_v21 = vadd.f32 %v524_v18, %v523_v14  ;;  %v513_v25 = vadd.f32 %v512_v8, %v511_v20 }
 0x171   : > { %v536_v22 = vrot.slane %v535_v19, 4  ;;  %v526_v23 = vrot.slane %v525_v21, 2  ;;  %v514_v32 = vrot.slane %v513_v25, 1 }
 0x173   : > { %v537_v24 = vadd.f32 %v536_v22, %v535_v19  ;;  %v527_v9 = vadd.f32 %v526_v23, %v525_v21  ;;  %v515_v35 = vadd.f32 %v514_v32, %v513_v25 }
 0x175   : > { %v538_v26 = vrot.slane %v537_v24, 2  ;;  %v528_v27 = vrot.slane %v527_v9, 1  ;;  %v556_v39 = vsel %vm555_vm6, %v515_v35, 0.0 }
 0x177   : > { %v539_v30 = vadd.f32 %v538_v26, %v537_v24  ;;  %v529_v36 = vadd.f32 %v528_v27, %v527_v9 }
 0x179   : > { %v540_v37 = vrot.slane %v539_v30, 1  ;;  %v559_v40 = vsel %vm558_vm7, %v529_v36, 0.0 }
 0x17a   : > { %v560_v46 = vadd.f32 %v559_v40, %v556_v39 }
 0x17b   : > { %v541_v41 = vadd.f32 %v540_v37, %v539_v30 }
 0x17d   : > { %v562_v47 = vsel %vm561_vm8, %v541_v41, 0.0 }
 0x17e   : > { %v563_v50 = vadd.f32 %v562_v47, %v560_v46 }
 0x1bb   : > { %v544_v31 = vpop.xlane.xlu0 %543 }
 0x1bf   : > { %v546_v33 = vpop.xlane.xlu1 %545 }
 0x1c0   : > { %v547_v34 = vadd.f32 %v546_v33, %v544_v31 }
 0x1c2   : > { %v548_v38 = vrot.slane %v547_v34, 4 }
 0x1c4   : > { %v549_v42 = vadd.f32 %v548_v38, %v547_v34 }
 0x1c6   : > { %v550_v44 = vrot.slane %v549_v42, 2 }
 0x1c8   : > { %v551_v45 = vadd.f32 %v550_v44, %v549_v42 }
 0x1ca   : > { %v552_v48 = vrot.slane %v551_v45, 1 }
 0x1cc   : > { %v553_v49 = vadd.f32 %v552_v48, %v551_v45 }
 0x1ce   : > { %v565_v51 = vsel %vm564_vm9, %v553_v49, 0.0 }
 0x1cf   : > { %v566_v52 = vadd.f32 %v565_v51, %v563_v50 }
 0x1d1   : > { %567 = vst [vmem:[%s265_s5] sm:$0xf] %v566_v52 }
 0x1d2   : > { %904 = shalt.err (!%p901_p6)
}
 0x1d3   : > { %s905_s8 = scalar_lea.hbm %s580_s4, 64  ;;  %s909_s22 = scalar_lea.hbm %s1363_s3, 128 }
 0x1d4   : > { %p906_p12 = scmp.ne.s32.totalorder %s580_s4, %s905_s8  ;;  %p910_p4 = scmp.lt.s32.totalorder %s580_s4, %s1363_s3 }
 0x1d5   : > { %p911_p2 = scmp.lt.s32.totalorder %s909_s22, %s905_s8 }
 0x1d6   : > { %p907_p0 = pnand %p906_p12, %p1381_p7 }
 0x1d7   : > { %p912_p5 = por %p911_p2, %p910_p4 }
 0x1d8   : > { %p908_p11 = pneg %p907_p0 }
 0x1da   : > { %p913_p13 = pnand %p912_p5, %p908_p11 }
 0x1dc   : > { %916 = shalt.err (!%p913_p13)
}
 0x1dd   : > { %733 = dma.vmem_to_hbm [thread:$0]  (%p1381_p7), %s583_s11, 64, %s580_s4, %s569_s27  }
 0x1de PF: > { %s594_s7 = sand.u32 1, %s947_s12   ;;  %p1382_p8 = scmp.ne.s32.totalorder %s1371_s24, 0 }
 0x1df   : > { %p1383_p10 = scmp.ge.s32.totalorder %s959_s15, 2  ;;  %s595_s9 = scalar_lea.sflag [#allocation4], %s594_s7 }
 0x1e1   : > { %p746_p1 = pnand %p1383_p10, %p1382_p8 }
 0x1e3   : > { %p747_p3 = pneg %p746_p1 }
 0x1e5   : > { %942 = dma.done.wait (%p747_p3), %s595_s9, 64  }
 0x1e6   : > { %944 = vsyncadd (%p747_p3), %s595_s9, 4294967232  ;;  %p19_p9 = scmp.ge.s32.totalorder %s1019_s18, 4   ;;  %s1384_s12 = smov %s951_s13 }
 0x1e7   : > { %s1385_s13 = smov %s955_s14  ;;  %s1386_s14 = smov %s1031_s21 }
 0x1e8   : > { %s1387_s15 = smov %s1019_s18  ;;  %21 = sbr.rel (!%p19_p9) target bundleno = 9 (0x9), region = 101 }
 0x1ed   :  { %600 = vsyncpa [#allocation3], 1 }
 0x1ee   :  { %602 = vsyncpa [#allocation3 + $0x1], 1 }
 0x1ef   :  { %603 = vsyncpa [#allocation6], 1 }
 0x1f0   :  { %605 = vsyncpa [#allocation6 + $0x1], 1 }
 0x1f1   :  { %606 = vsyncpa [#allocation4], 1 }
 0x1f2   :  { %608 = vsyncpa [#allocation4 + $0x1], 1 }

</bundles_post_ra>
